<compile_context>
chip_gen: v7x
topology: tpu7x:2x2x1
jax: 0.10.0
libtpu: 0.0.40
codegen_flags: <defaults>
</compile_context>

<pallas_src>
import functools

import jax
import jax.numpy as jnp
import numpy as np
from jax.experimental import pallas as pl
from jax.experimental.pallas import tpu as pltpu


def _layernorm(v, gamma, beta, eps=1e-5):
    mu = jnp.mean(v, axis=-1, keepdims=True)
    var = jnp.mean((v - mu) ** 2, axis=-1, keepdims=True)
    return (v - mu) * jax.lax.rsqrt(var + eps) * gamma + beta


def _default_vmem_limit():
    cap = 128 * 1024 * 1024
    try:
        info = pltpu.get_tpu_info()
        cap = int(getattr(info, "vmem_capacity_bytes", cap)) or cap
    except Exception:
        pass
    # leave headroom; never claim the whole physical VMEM (v7x has 64 MiB)
    return min((cap * 3) // 4, 96 * 1024 * 1024)


# --------------------------------------------------------------------------
# Kernel 1: fused QKV projection.  One full-width (block_p, D) x (D, 3D)
# matmul per position tile; q columns are pre-scaled by 1/sqrt(dk) host-side.
# --------------------------------------------------------------------------
def qkv_proj_kernel(x_ref, wqkv_ref, bqkv_ref, o_ref, *, compute_dtype):
    y = jnp.dot(x_ref[...].astype(compute_dtype), wqkv_ref[...],
                preferred_element_type=jnp.float32) + bqkv_ref[...]
    o_ref[...] = y.astype(o_ref.dtype)


# --------------------------------------------------------------------------
# Kernel 2: flash attention (online softmax) + out projection + residual +
# norm1 + FFN + residual + norm2, fused.  Grid = (B, nq, nk).
# --------------------------------------------------------------------------
def encoder_attn_ffn_kernel(
    # inputs
    x_ref, q_ref, k_ref, v_ref,
    wo_ref, bo_ref, g1_ref, bt1_ref, w1_ref, bf1_ref, w2_ref, bf2_ref,
    g2_ref, bt2_ref,
    # outputs
    o_ref,
    # scratch
    m_scr, l_scr, acc_scr,
    *, compute_dtype,
):
    cdt = compute_dtype
    ki = pl.program_id(2)
    nk = pl.num_programs(2)

    # ---- init online-softmax state (per (b, qi)) ---------------------------
    @pl.when(ki == 0)
    def _init():
        m_scr[...] = jnp.full(m_scr.shape, -jnp.inf, m_scr.dtype)
        l_scr[...] = jnp.zeros(l_scr.shape, l_scr.dtype)
        acc_scr[...] = jnp.zeros(acc_scr.shape, acc_scr.dtype)

    # ---- one KV tile: q is already projected & scaled ----------------------
    s = jnp.einsum("hle,hse->hls", q_ref[...], k_ref[...],
                   preferred_element_type=jnp.float32)     # (H, blk_q, blk_kv)
    m_prev = m_scr[...]
    m_new = jnp.maximum(m_prev, jnp.max(s, axis=-1, keepdims=True))
    alpha = jnp.exp(m_prev - m_new)
    p = jnp.exp(s - m_new)                                 # f32 exp (v5e-safe)
    l_scr[...] = alpha * l_scr[...] + jnp.sum(p, axis=-1, keepdims=True)
    acc_scr[...] = alpha * acc_scr[...] + jnp.einsum(
        "hls,hse->hle", p.astype(cdt), v_ref[...],
        preferred_element_type=jnp.float32)
    m_scr[...] = m_new

    # ---- finalize: out-projection, residual+norm1, FFN, residual+norm2 -----
    @pl.when(ki == nk - 1)
    def _finalize():
        inv_l = pl.reciprocal(l_scr[...], approx=False)
        attn = (acc_scr[...] * inv_l).astype(cdt)          # (H, blk_q, dk)
        # per-head out projection (N = D), summed over heads == concat+Linear
        new_x = jnp.sum(
            jnp.einsum("hle,hem->hlm", attn, wo_ref[...],
                       preferred_element_type=jnp.float32),
            axis=0) + bo_ref[...]                          # (blk_q, D)

        x_res = x_ref[...].astype(jnp.float32)
        xn = _layernorm(x_res + new_x, g1_ref[...], bt1_ref[...])

        y = jnp.dot(xn.astype(cdt), w1_ref[...],
                    preferred_element_type=jnp.float32) + bf1_ref[...]
        y = jnp.maximum(y, 0.0)
        y = jnp.dot(y.astype(cdt), w2_ref[...],
                    preferred_element_type=jnp.float32) + bf2_ref[...]

        out = _layernorm(xn + y, g2_ref[...], bt2_ref[...])
        o_ref[...] = out.astype(o_ref.dtype)


def encoder_layer(x, params, n_heads, *, block_q=256, block_kv=256,
                  block_p=256, compute_dtype=jnp.bfloat16):
    B, L, D = x.shape
    H = n_heads
    assert D % H == 0
    dk = D // H
    d_ff = params["w1"].shape[0]
    scale = dk ** (-0.5)

    block_q = min(block_q, L)
    block_kv = min(block_kv, L)
    block_p = min(block_p, L)
    assert L % block_q == 0 and L % block_kv == 0 and L % block_p == 0

    cdt = compute_dtype
    f32 = jnp.float32
    cbytes = jnp.dtype(cdt).itemsize
    vmem_limit = _default_vmem_limit()

    # --- host-side weight preparation ---------------------------------------
    # fused QKV weight (D, 3D), pre-transposed; 1/sqrt(dk) folded into q part
    wqkv = jnp.concatenate(
        [params["wq"].T * scale, params["wk"].T, params["wv"].T],
        axis=1).astype(cdt)                                    # (D, 3D)
    bqkv = jnp.concatenate(
        [params["bq"] * scale, params["bk"], params["bv"]],
        axis=-1).astype(f32)                                   # (1, 3D)

    wo_h = params["wo"].T.reshape(H, dk, D).astype(cdt)        # (H, dk, D)
    bo = params["bo"].astype(f32)                              # (1, D)
    g1 = params["g1"].astype(f32)
    bt1 = params["bt1"].astype(f32)
    g2 = params["g2"].astype(f32)
    bt2 = params["bt2"].astype(f32)
    w1_t = params["w1"].T.astype(cdt)                          # (D, d_ff)
    bf1 = params["bf1"].astype(f32)                            # (1, d_ff)
    w2_t = params["w2"].T.astype(cdt)                          # (d_ff, D)
    bf2 = params["bf2"].astype(f32)                            # (1, D)

    # ---------------- kernel 1: QKV projection ------------------------------
    np_p = L // block_p
    proj_cost = pl.CostEstimate(
        flops=int(6 * B * L * D * D),
        transcendentals=0,
        bytes_accessed=int(B * L * D * x.dtype.itemsize
                           + int(wqkv.size) * cbytes + int(bqkv.size) * 4
                           + B * L * 3 * D * cbytes))
    qkv = pl.pallas_call(
        functools.partial(qkv_proj_kernel, compute_dtype=cdt),
        out_shape=jax.ShapeDtypeStruct((B, L, 3 * D), cdt),
        grid_spec=pltpu.PrefetchScalarGridSpec(
            num_scalar_prefetch=0,
            grid=(B, np_p),
            in_specs=[
                pl.BlockSpec((None, block_p, D), lambda b, i: (b, i, 0)),
                pl.BlockSpec((D, 3 * D), lambda b, i: (0, 0)),
                pl.BlockSpec((1, 3 * D), lambda b, i: (0, 0)),
            ],
            out_specs=pl.BlockSpec((None, block_p, 3 * D),
                                   lambda b, i: (b, i, 0))),
        compiler_params=pltpu.CompilerParams(
            dimension_semantics=("parallel", "parallel"),
            vmem_limit_bytes=vmem_limit),
        cost_estimate=proj_cost,
    )(x, wqkv, bqkv)

    # head split (layout plumbing, done once): (B, L, 3D) -> (B, 3H, L, dk)
    # index j along the 3H axis: [0,H) = q heads, [H,2H) = k, [2H,3H) = v
    qkv_heads = qkv.reshape(B, L, 3 * H, dk).transpose(0, 2, 1, 3)

    # ---------------- kernel 2: attention + FFN + norms ----------------------
    nq = L // block_q
    nk = L // block_kv
    param_list = [wo_h, bo, g1, bt1, w1_t, bf1, w2_t, bf2, g2, bt2]

    def full_spec(a):
        nd = a.ndim
        return pl.BlockSpec(a.shape, lambda b, qi, ki, _nd=nd: (0,) * _nd)

    in_specs = [
        pl.BlockSpec((None, block_q, D), lambda b, qi, ki: (b, qi, 0)),       # x (residual)
        pl.BlockSpec((None, H, block_q, dk), lambda b, qi, ki: (b, 0, qi, 0)),  # q heads
        pl.BlockSpec((None, H, block_kv, dk), lambda b, qi, ki: (b, 1, ki, 0)), # k heads
        pl.BlockSpec((None, H, block_kv, dk), lambda b, qi, ki: (b, 2, ki, 0)), # v heads
    ] + [full_spec(p) for p in param_list]
    out_spec = pl.BlockSpec((None, block_q, D), lambda b, qi, ki: (b, qi, 0))

    attn_flops = int(B * (4 * L * L * D + 2 * L * D * D + 4 * L * D * d_ff))
    attn_trans = int(B * H * L * L + 4 * B * L)
    attn_bytes = int(
        B * L * D * x.dtype.itemsize              # x residual read
        + B * L * D * cbytes                      # q read (once)
        + 2 * nq * B * L * D * cbytes             # k, v streamed per q tile
        + B * L * D * x.dtype.itemsize            # output write
        + sum(int(p.size) * p.dtype.itemsize for p in param_list))
    attn_cost = pl.CostEstimate(flops=attn_flops, transcendentals=attn_trans,
                                bytes_accessed=attn_bytes)

    return pl.pallas_call(
        functools.partial(encoder_attn_ffn_kernel, compute_dtype=cdt),
        out_shape=jax.ShapeDtypeStruct((B, L, D), x.dtype),
        grid_spec=pltpu.PrefetchScalarGridSpec(
            num_scalar_prefetch=0,
            grid=(B, nq, nk),
            in_specs=in_specs,
            out_specs=out_spec,
            scratch_shapes=[
                pltpu.VMEM((H, block_q, 1), jnp.float32),   # running max
                pltpu.VMEM((H, block_q, 1), jnp.float32),   # running sum
                pltpu.VMEM((H, block_q, dk), jnp.float32),  # attention acc
            ]),
        compiler_params=pltpu.CompilerParams(
            dimension_semantics=("parallel", "parallel", "arbitrary"),
            vmem_limit_bytes=vmem_limit),
        cost_estimate=attn_cost,
    )(x, qkv_heads, qkv_heads, qkv_heads, *param_list)


def make_params(key, d_model, n_heads, d_ff):
    ks = jax.random.split(key, 12)
    f32 = jnp.float32
    return {
        # attention projections (nn.Linear: weight (out, in), bias (out,))
        "wq": jax.random.normal(ks[0], (d_model, d_model), f32) * 0.05,
        "bq": (jax.random.normal(ks[1], (d_model,), f32) * 0.01).reshape(1, d_model),
        "wk": jax.random.normal(ks[2], (d_model, d_model), f32) * 0.05,
        "bk": (jax.random.normal(ks[3], (d_model,), f32) * 0.01).reshape(1, d_model),
        "wv": jax.random.normal(ks[4], (d_model, d_model), f32) * 0.05,
        "bv": (jax.random.normal(ks[5], (d_model,), f32) * 0.01).reshape(1, d_model),
        "wo": jax.random.normal(ks[6], (d_model, d_model), f32) * 0.05,
        "bo": (jax.random.normal(ks[7], (d_model,), f32) * 0.01).reshape(1, d_model),
        # layernorms
        "g1": jnp.ones((1, d_model), f32),
        "bt1": jnp.zeros((1, d_model), f32),
        "g2": jnp.ones((1, d_model), f32),
        "bt2": jnp.zeros((1, d_model), f32),
        # conv1 (d_model->d_ff, k=1) and conv2 (d_ff->d_model, k=1), squeezed
        "w1": jax.random.normal(ks[8], (d_ff, d_model), f32) * 0.05,
        "bf1": (jax.random.normal(ks[9], (d_ff,), f32) * 0.01).reshape(1, d_ff),
        "w2": jax.random.normal(ks[10], (d_model, d_ff), f32) * 0.05,
        "bf2": (jax.random.normal(ks[11], (d_model,), f32) * 0.01).reshape(1, d_model),
    }


def encoder_layer_ref(x, p, n_heads):
    """Pure-JAX reference mirroring the PyTorch forward (dropout=identity)."""
    B, L, D = x.shape
    dk = D // n_heads
    scale = dk ** (-0.5)

    q = x @ p["wq"].T + p["bq"]
    k = x @ p["wk"].T + p["bk"]
    v = x @ p["wv"].T + p["bv"]
    q = q.reshape(B, L, n_heads, dk)
    k = k.reshape(B, L, n_heads, dk)
    v = v.reshape(B, L, n_heads, dk)
    scores = jnp.einsum("blhe,bshe->bhls", q, k)
    attn = jax.nn.softmax(scores * scale, axis=-1)
    V = jnp.einsum("bhls,bshe->blhe", attn, v).reshape(B, L, D)
    new_x = V @ p["wo"].T + p["bo"]

    def ln(v_, g, b, eps=1e-5):
        mu = jnp.mean(v_, axis=-1, keepdims=True)
        var = jnp.mean((v_ - mu) ** 2, axis=-1, keepdims=True)
        return (v_ - mu) / jnp.sqrt(var + eps) * g + b

    x1 = ln(x + new_x, p["g1"], p["bt1"])
    y = jnp.maximum(x1 @ p["w1"].T + p["bf1"], 0.0)
    y = y @ p["w2"].T + p["bf2"]
    return ln(x1 + y, p["g2"], p["bt2"])


if __name__ == "__main__":
    # Small but lane-dense demo shapes (D multiple of 128).
    B, L = 2, 16
    d_model, n_heads = 128, 4
    d_ff = 4 * d_model

    key = jax.random.PRNGKey(0)
    kx, kp = jax.random.split(key)
    x = jax.random.normal(kx, (B, L, d_model), jnp.float32)
    params = make_params(kp, d_model, n_heads, d_ff)

    ref = encoder_layer_ref(x, params, n_heads)

    # f32 path; small tiles so several query/KV grid steps are exercised.
    out = encoder_layer(x, params, n_heads, block_q=8, block_kv=8, block_p=8,
                        compute_dtype=jnp.float32)
    out = jax.block_until_ready(out)
    np.testing.assert_allclose(np.asarray(out), np.asarray(ref),
                               rtol=1e-4, atol=1e-4)

    # bf16 MXU path (f32 accumulation / statistics), looser tolerance.
    out_bf16 = encoder_layer(x, params, n_heads, block_q=8, block_kv=8,
                             block_p=8, compute_dtype=jnp.bfloat16)
    out_bf16 = jax.block_until_ready(out_bf16)
    np.testing.assert_allclose(np.asarray(out_bf16), np.asarray(ref),
                               rtol=1e-1, atol=1e-1)

    print("KERNEL_OK")
</pallas_src>

<mosaic_0001>
module attributes {stable_mosaic.version = 11 : i64} {
  func.func @qkv_proj_kernel(%arg0: i32, %arg1: i32, %arg2: memref<1x8x128xf32, #tpu.memory_space<vmem>>, %arg3: memref<128x384xf32, #tpu.memory_space<vmem>>, %arg4: memref<1x384xf32, #tpu.memory_space<vmem>>, %arg5: memref<1x8x384xf32, #tpu.memory_space<vmem>>) attributes {dimension_semantics = [#tpu.dimension_semantics<parallel>, #tpu.dimension_semantics<parallel>], iteration_bounds = array<i64: 2, 2>, scalar_prefetch = 0 : i64, scratch_operands = 0 : i64, tpu.core_type = #tpu.core_type<tc>, window_params = [{transform_indices = @transform_0, window_bounds = array<i64: 1, 8, 128>}, {pipeline_mode = #tpu.pipeline_mode<synchronous>, transform_indices = @transform_1, window_bounds = array<i64: 128, 384>}, {pipeline_mode = #tpu.pipeline_mode<synchronous>, transform_indices = @transform_2, window_bounds = array<i64: 1, 384>}, {transform_indices = @transform_3, window_bounds = array<i64: 1, 8, 384>}]} {
    %c0 = arith.constant 0 : index
    %c0_0 = arith.constant 0 : index
    %c0_1 = arith.constant 0 : index
    %0 = vector.load %arg2[%c0, %c0_0, %c0_1] : memref<1x8x128xf32, #tpu.memory_space<vmem>>, vector<1x8x128xf32>
    %1 = vector.shape_cast %0 : vector<1x8x128xf32> to vector<8x128xf32>
    %c0_2 = arith.constant 0 : index
    %c0_3 = arith.constant 0 : index
    %2 = vector.load %arg3[%c0_2, %c0_3] : memref<128x384xf32, #tpu.memory_space<vmem>>, vector<128x384xf32>
    %cst = arith.constant dense<0.000000e+00> : vector<8x384xf32>
    %3 = tpu.matmul %1, %2, %cst {dimension_numbers = #tpu.dot_dimension_numbers<[1], [0], [0], [1], [0, 0, 1, 1], [], []>} : vector<8x128xf32>, vector<128x384xf32>, vector<8x384xf32> -> vector<8x384xf32>
    %c0_4 = arith.constant 0 : index
    %c0_5 = arith.constant 0 : index
    %4 = vector.load %arg4[%c0_4, %c0_5] : memref<1x384xf32, #tpu.memory_space<vmem>>, vector<1x384xf32>
    %5 = vector.broadcast %4 : vector<1x384xf32> to vector<8x384xf32>
    %6 = arith.addf %3, %5 : vector<8x384xf32>
    %c0_6 = arith.constant 0 : index
    %c0_7 = arith.constant 0 : index
    %c0_8 = arith.constant 0 : index
    %7 = vector.load %arg5[%c0_6, %c0_7, %c0_8] : memref<1x8x384xf32, #tpu.memory_space<vmem>>, vector<1x8x384xf32>
    %8 = vector.shape_cast %7 : vector<1x8x384xf32> to vector<8x384xf32>
    %9 = vector.shape_cast %6 : vector<8x384xf32> to vector<1x8x384xf32>
    tpu.vector_store %arg5[%c0_6, %c0_7, %c0_8], %9 {strides = array<i32>} : memref<1x8x384xf32, #tpu.memory_space<vmem>>, vector<1x8x384xf32>,
    return
  }
  func.func @transform_0(%arg0: i32, %arg1: i32) -> (i32, i32, i32) {
    %c0_i32 = arith.constant 0 : i32
    %c0_i32_0 = arith.constant 0 : i32
    return %arg0, %arg1, %c0_i32 : i32, i32, i32
  }
  func.func @transform_1(%arg0: i32, %arg1: i32) -> (i32, i32) {
    %c0_i32 = arith.constant 0 : i32
    %c0_i32_0 = arith.constant 0 : i32
    %c0_i32_1 = arith.constant 0 : i32
    return %c0_i32, %c0_i32_0 : i32, i32
  }
  func.func @transform_2(%arg0: i32, %arg1: i32) -> (i32, i32) {
    %c0_i32 = arith.constant 0 : i32
    %c0_i32_0 = arith.constant 0 : i32
    %c0_i32_1 = arith.constant 0 : i32
    return %c0_i32, %c0_i32_0 : i32, i32
  }
  func.func @transform_3(%arg0: i32, %arg1: i32) -> (i32, i32, i32) {
    %c0_i32 = arith.constant 0 : i32
    %c0_i32_0 = arith.constant 0 : i32
    return %arg0, %arg1, %c0_i32 : i32, i32, i32
  }
}

</mosaic_0001>

<bundles_post_ra>
// kernel: tpu_custom_call.1
= control target key start
LH: loop header
LB: loop body
LE: loop exit
PB: predicated region body
PF: predicated region fallthrough
CT: control target
= control target key end

     0   :  { %s1295_s0 = inlined_call_operand.hbm [shape: f32[2,16,128], index: 0, kind: input, shape index: {}]   ;;  %s1296_s1 = inlined_call_operand.hbm [shape: f32[128,384], index: 1, kind: input, shape index: {}]   ;;  %s1297_s2 = inlined_call_operand.hbm [shape: f32[1,384], index: 2, kind: input, shape index: {}]   ;;  %s1298_s3 = inlined_call_operand.hbm [shape: f32[2,16,384], index: 3, kind: output, shape index: {}]  }
   0x1   :  { %1305 = sst [smem:[#allocation14_spill]] %s1296_s1 }
   0x2   :  { %1306 = sst [smem:[#allocation15_spill]] %s1297_s2 }
   0x3   :  { %8 = vsyncpa [#allocation3], 0 }
   0x4   :  { %10 = vsyncpa [#allocation3 + $0x1], 0 }
   0x5   :  { %11 = vsyncpa [#allocation6], 0 }
   0x6   :  { %12 = vsyncpa [#allocation4], 0 }
   0x7   :  { %14 = vsyncpa [#allocation4 + $0x1], 0  ;;  %s1013_s12 = smov 0   ;;  %s1015_s13 = smov 0  }
   0x8   :  { %s1017_s14 = smov 0   ;;  %s1019_s15 = smov 0  }
   0x9   :  { %s1021_s16 = smov 0   ;;  %s1023_s17 = smov 0  }
   0xa   :  { %s1025_s18 = smov 0   ;;  %s1027_s19 = smov 0  }
   0xb LB: > { %s563_s20 = sadd.s32 4294967295, %s982_s19   ;;  %s564_s21 = sadd.s32 4294967294, %s982_s19   ;;  %s982_s19 = sphi %s1027_s19, %s20_s19   ;;  %s978_s18 = sphi %s1025_s18, %s1331_s18   ;;  %s974_s17 = sphi %s1023_s17, %s1330_s17   ;;  %s970_s16 = sphi %s1021_s16, %s1329_s16   ;;  %s966_s15 = sphi %s1019_s15, %s1328_s15   ;;  %s962_s14 = sphi %s1017_s14, %s1327_s14   ;;  %s958_s13 = sphi %s1015_s13, %s1326_s13   ;;  %s954_s12 = sphi %s1013_s12, %s1325_s12  }
   0xc   : > { %p54_p0 = scmp.ne.s32.totalorder %s958_s13, %s954_s12  ;;  %p1059_p1 = scmp.eq.s32.totalorder %s563_s20, 0 }
   0xd   : > { %p128_p2 = scmp.eq.s32.totalorder %s564_s21, 3  ;;  %p565_p4 = scmp.ge.s32.totalorder %s982_s19, 1 }
   0xe   : > { %s1307_s22 = scalar_select %p1059_p1, 1, 0 }
   0xf   : > { %p1065_p3 = por %p1059_p1, %p54_p0  ;;  %p1070_p5 = por %p128_p2, %p54_p0 }
  0x10   : > { %p135_p6 = scmp.lt.s32.totalorder %s982_s19, 5  ;;  %s984_s26 = smov [#allocation5]  }
  0x11   : > { %s1308_s23 = scalar_select %p1065_p3, 1, 0 }
  0x12   : > { %s1309_s24 = scalar_select %p1070_p5, 1, 0 }
  0x13   : > { %p1075_p7 = pnand %p565_p4, %p135_p6  ;;  %s147_s27 = sshll.u32 %s984_s26, 4  ;;  %s148_s27 = int_to_ptr.vmem [resolvable:$true] %s147_s27 }
  0x14   : > { %1310 = sst [smem:[#allocation12_spill]] %s1309_s24  ;;  %s985_s29 = smov [#allocation7]  }
  0x15   : > { %s1311_s25 = scalar_select %p1075_p7, 1, 0 }
  0x16   : > { %p702_p8 = pneg %p1075_p7  ;;  %s161_s30 = sshll.u32 %s985_s29, 4  ;;  %s1087_s30 = int_to_ptr.vmem [resolvable:$true] %s161_s30 }
  0x17   : > { %s1313_s1 = sld [smem:[#allocation14_spill]] }
  0x18   : > { %p1083_p9 = pnand %p702_p8, %p1059_p1 }
  0x1a   : > { %p796_p11 = pneg %p1083_p9 }
  0x1d   : > { %s794_s6 = scalar_lea.hbm %s1313_s1, 6144 }
  0x1e   : > { %p795_p10 = scmp.ne.s32.totalorder %s1313_s1, %s794_s6  ;;  %p801_p0 = scmp.lt.u32.totalorder %s794_s6, %s1313_s1 }
  0x20   : > { %p797_p12 = pnand %p796_p11, %p795_p10 }
  0x22   : > { %p798_p13 = pneg %p797_p12 }
  0x24   : > { %p803_p2 = pnand %p801_p0, %p798_p13 }
  0x26   : > { %806 = shalt.err (!%p803_p2)
}
  0x27   : > { %s807_s11 = scalar_lea.vmem %s148_s27, 6144  ;;  %p815_p5 = scmp.lt.s32.totalorder %s148_s27, %s148_s27 }
  0x28   : > { %p808_p4 = scmp.ne.s32.totalorder %s148_s27, %s807_s11  ;;  %p816_p1 = scmp.lt.s32.totalorder %s807_s11, %s807_s11 }
  0x2a   : > { %p810_p6 = pnand %p808_p4, %p796_p11  ;;  %p817_p3 = por %p816_p1, %p815_p5 }
  0x2c   : > { %p811_p8 = pneg %p810_p6 }
  0x2e   : > { %p818_p7 = pnand %p817_p3, %p811_p8 }
  0x30   : > { %821 = shalt.err (!%p818_p7)
}
  0x31   : > { %s986_s21 = smov 384   ;;  %s987_s26 = smov 24  }
  0x32   : > { %705 = dma.hbm_to_vmem [thread:$0]  (!%p1083_p9), %s1313_s1, 6144, %s148_s27, [#allocation6], %s986_s21, %s986_s21, %s987_s26  }
  0x33   : > { %s1314_s2 = sld [smem:[#allocation15_spill]] }
  0x39   : > { %s822_s7 = scalar_lea.hbm %s1314_s2, 48 }
  0x3a   : > { %p823_p10 = scmp.ne.s32.totalorder %s1314_s2, %s822_s7  ;;  %p829_p5 = scmp.lt.u32.totalorder %s822_s7, %s1314_s2 }
  0x3c   : > { %p825_p1 = pnand %p823_p10, %p796_p11 }
  0x3e   : > { %p826_p3 = pneg %p825_p1 }
  0x40   : > { %p831_p7 = pnand %p829_p5, %p826_p3 }
  0x42   : > { %834 = shalt.err (!%p831_p7)
}
  0x43   : > { %s835_s27 = scalar_lea.vmem %s1087_s30, 48  ;;  %s842_s21 = scalar_lea.vmem %s1087_s30, 64 }
  0x44   : > { %p836_p12 = scmp.ne.s32.totalorder %s1087_s30, %s835_s27  ;;  %p843_p2 = scmp.lt.s32.totalorder %s1087_s30, %s1087_s30 }
  0x45   : > { %p844_p4 = scmp.lt.s32.totalorder %s842_s21, %s835_s27 }
  0x46   : > { %p838_p13 = pnand %p836_p12, %p796_p11 }
  0x47   : > { %p845_p6 = por %p844_p4, %p843_p2 }
  0x48   : > { %p839_p0 = pneg %p838_p13 }
  0x4a   : > { %p846_p8 = pnand %p845_p6, %p839_p0 }
  0x4c   : > { %849 = shalt.err (!%p846_p8)
}
  0x4d   : > { %708 = dma.hbm_to_vmem [thread:$0]  (!%p1083_p9), %s1314_s2, 48, %s1087_s30, [#allocation6]  }
  0x4e   : > { %p122_p11 = scmp.eq.s32.totalorder %s563_s20, 3  ;;  %s29_s4 = sadd.s32 1, %s974_s17 }
  0x4f   : > { %p30_p10 = scmp.ge.s32.totalorder %s29_s4, 2  ;;  %s32_s28 = sadd.s32 1, %s978_s18 }
  0x50   : > { %p48_p1 = scmp.ne.s32.totalorder %s962_s14, %s958_s13  ;;  %p49_p3 = scmp.eq.s32.totalorder %s982_s19, 0 }
  0x51   : > { %s1333_s4 = smov (%p30_p10, %s29_s4), 0  ;;  %s1335_s28 = smov (!%p30_p10, %s32_s28), %s978_s18 }
  0x52   : > { %1315 = sst [smem:[#allocation13_spill]] %s1333_s4  ;;  %s37_s5 = ssub.s32 %s974_s17, %s1333_s4 }
  0x53   : > { %s41_s6 = sadd.s32 1, %s962_s14  ;;  %p34_p5 = scmp.ge.s32.totalorder %s1335_s28, 2 }
  0x54   : > { %p1150_p9 = por %p122_p11, %p48_p1  ;;  %p1154_p7 = por %p49_p3, %p48_p1 }
  0x55   : > { %s172_s7 = sand.u32 1, %s962_s14   ;;  %s1337_s28 = smov (%p34_p5, %s1335_s28), 0 }
  0x56   : > { %p719_p12 = scmp.lt.s32.totalorder %s982_s19, 4  ;;  %s569_s8 = sshll.u32 %s172_s7, 3 }
  0x57   : > { %s36_s9 = ssub.s32 %s978_s18, %s1337_s28  ;;  %s570_s11 = sshll.u32 %s978_s18, 1 }
  0x58   : > { %s38_s10 = sor.u32 %s37_s5, %s36_s9  ;;  %s181_s27 = sadd.s32 %s974_s17, %s570_s11 }
  0x59   : > { %p39_p13 = scmp.eq.s32.totalorder %s38_s10, 0  ;;  %s571_s21 = sshll.u32 %s181_s27, 7 }
  0x5a   : > { %s176_s26 = scalar_lea.vmem [#allocation2], %s569_s8  ;;  %s1172_s24 = scalar_lea.hbm %s1295_s0, %s571_s21 }
  0x5b   : > { %s185_s29 = sshll.u32 %s176_s26, 4  ;;  %p1180_p0 = pnand %p719_p12, %p1154_p7  ;;  %s1174_s29 = int_to_ptr.vmem [resolvable:$true] %s185_s29 }
  0x5c   : > { %s1167_s1 = scalar_select %p39_p13, %s962_s14, %s41_s6  }
  0x5d   : > { %s173_s6 = scalar_lea.sflag [#allocation3], %s172_s7  ;;  %s850_s8 = scalar_lea.hbm %s1172_s24, 128 }
  0x5e   : > { %p851_p2 = scmp.ne.s32.totalorder %s1172_s24, %s850_s8  ;;  %p852_p4 = pneg %p1180_p0 }
  0x5f   : > { %s855_s20 = scalar_lea.hbm %s1295_s0, 512  ;;  %p856_p11 = scmp.lt.u32.totalorder %s1172_s24, %s1295_s0 }
  0x60   : > { %p853_p6 = pnand %p852_p4, %p851_p2  ;;  %p857_p10 = scmp.lt.u32.totalorder %s855_s20, %s850_s8 }
  0x61   : > { %p859_p3 = scmp.lt.u32.totalorder %s850_s8, %s1172_s24 }
  0x62   : > { %p854_p8 = pneg %p853_p6  ;;  %p858_p1 = por %p857_p10, %p856_p11 }
  0x64   : > { %p860_p5 = por %p859_p3, %p858_p1 }
  0x66   : > { %p861_p7 = pnand %p860_p5, %p854_p8 }
  0x68   : > { %864 = shalt.err (!%p861_p7)
}
  0x69   : > { %s865_s7 = scalar_lea.vmem %s1174_s29, 128  ;;  %s988_s11 = smov [#allocation2]  }
  0x6a   : > { %p866_p12 = scmp.ne.s32.totalorder %s1174_s29, %s865_s7  ;;  %s870_s27 = sshll.u32 %s988_s11, 4  ;;  %s871_s27 = int_to_ptr.vmem [resolvable:$false] %s870_s27 }
  0x6b   : > { %s872_s21 = scalar_lea.vmem %s871_s27, 256  ;;  %p873_p6 = scmp.lt.s32.totalorder %s1174_s29, %s871_s27 }
  0x6c   : > { %p868_p13 = pnand %p866_p12, %p852_p4  ;;  %p874_p11 = scmp.lt.s32.totalorder %s872_s21, %s865_s7 }
  0x6e   : > { %p869_p2 = pneg %p868_p13  ;;  %p875_p10 = por %p874_p11, %p873_p6 }
  0x70   : > { %p876_p1 = pnand %p875_p10, %p869_p2 }
  0x72   : > { %879 = shalt.err (!%p876_p1)
}
  0x73   : > { %712 = dma.hbm_to_vmem [thread:$0]  (!%p1180_p0), %s1172_s24, 128, %s1174_s29, %s173_s6  }
  0x74   : > { %p1319_p8 = scmp.ne.s32.totalorder %s1311_s25, 0 }
  0x75   : > { %s1212_s26 = sand.u32 (!%p1319_p8), 1, %s958_s13   ;;  %p1320_p4 = scmp.ne.s32.totalorder (!%p1319_p8), %s1308_s23, 0 }
  0x76   : > { %194 = sbr.rel (%p1319_p8) target bundleno = 394 (0x18a), region = 32  ;;  %s573_s8 = sshll.u32 (!%p1319_p8), %s1212_s26, 3 }
  0x77   : > { %s197_s2 = scalar_lea.sflag (!%p1319_p8), [#allocation3], %s1212_s26  ;;  %s1216_s4 = scalar_lea.vmem (!%p1319_p8), [#allocation2], %s573_s8 }
  0x7d   : > { %941 = dma.done.wait (%p1320_p4), %s197_s2, 128  }
  0x7e   : > { %943 = vsyncadd (%p1320_p4), %s197_s2, 4294967168  ;;  %p1321_p0 = scmp.ne.s32.totalorder %s1307_s22, 0 }
  0x80   : > { %945 = dma.done.wait (%p1321_p0), [#allocation6], 6192  }
  0x81   : > { %947 = vsyncadd (%p1321_p0), [#allocation6], 4294961104  ;;  %v989_v0 = vmov 0.0|0.0   ;;  %v990_v1 = vmov 0.0   ;;  %vm991_vm0 = vmmov 0   ;;  %v233_v2 = vld [vmem:[#allocation5 + $0x8] sm:$0xff] }
  0x82   : > { %663 = vmatprep.subr.bf16.mxu1 %v989_v0  ;;  %361 = vmatprep.mubr.f32.mxu0 %v990_v1  ;;  %v236_v3 = vld [vmem:[#allocation5 + $0x20] sm:$0xff]  ;;  %v235_v6 = vld [vmem:[#allocation5 + $0x18] sm:$0xff]  ;;  %v234_v7 = vld [vmem:[#allocation5 + $0x10] sm:$0xff]  ;;  %s687_s22 = smul.u32 24, %s1212_s26  ;;  %s442_s9 = scalar_lea.sflag [#allocation4], %s1212_s26 }
  0x83   : > { %628 = vmatprep.mubr.msk.f32.mxu1 %vm991_vm0, %v990_v1  ;;  %v232_v4 = vld [vmem:[#allocation5] sm:$0xff]  ;;  %v631_v5 = vpack.c.bf16 %v236_v3, %v233_v2  ;;  %v237_v8 = vld [vmem:[#allocation5 + $0x28] sm:$0xff]  ;;  %v239_v11 = vld [vmem:[#allocation5 + $0x38] sm:$0xff]  ;;  %s688_s23 = smul.u32 3, %s966_s15  ;;  %s992_s7 = smov [#allocation8]  }
  0x84   : > { %v633_v9 = vpack.c.bf16 %v235_v6, %v232_v4  ;;  %v664_v10 = vpack.c.bf16 %v237_v8, %v234_v7  ;;  %v242_v12 = vld [vmem:[#allocation5 + $0x50] sm:$0xff]  ;;  %v241_v15 = vld [vmem:[#allocation5 + $0x48] sm:$0xff]  ;;  %v240_v16 = vld [vmem:[#allocation5 + $0x40] sm:$0xff]  ;;  %s689_s24 = smul.u32 6, %s970_s16  ;;  %s230_s5 = scalar_lea.vmem [#allocation8], %s687_s22 }
  0x85   : > { %v238_v13 = vld [vmem:[#allocation5 + $0x30] sm:$0xff]  ;;  %632 = vmatprep.subr.bf16.mxu0 %v631_v5  ;;  %v635_v14 = vpack.c.bf16 %v242_v12, %v239_v11  ;;  %v243_v17 = vld [vmem:[#allocation5 + $0x58] sm:$0xff]  ;;  %v245_v20 = vld [vmem:[#allocation5 + $0x68] sm:$0xff]  ;;  %v282_v12 = vlaneseq  ;;  %s458_s6 = sshll.u32 %s230_s5, 4  ;;  %s884_s11 = sshll.u32 %s992_s7, 4  ;;  %s1243_s6 = int_to_ptr.vmem [resolvable:$true] %s458_s6  ;;  %s885_s11 = int_to_ptr.vmem [resolvable:$false] %s884_s11 }
  0x86   : > { %634 = vmatpush1.bf16.msra.mxu0 %v633_v9  ;;  %665 = vmatpush3.bf16.msra.mxu1 %v664_v10  ;;  %v637_v18 = vpack.c.bf16 %v241_v15, %v238_v13  ;;  %v667_v19 = vpack.c.bf16 %v243_v17, %v240_v16  ;;  %v248_v21 = vld [vmem:[#allocation5 + $0x80] sm:$0xff]  ;;  %v247_v24 = vld [vmem:[#allocation5 + $0x78] sm:$0xff]  ;;  %v246_v25 = vld [vmem:[#allocation5 + $0x70] sm:$0xff]  ;;  %s454_s25 = sadd.s32 %s689_s24, %s688_s23  ;;  %s880_s10 = scalar_lea.vmem %s1243_s6, 384 }
  0x87   : > { %v244_v22 = vld [vmem:[#allocation5 + $0x60] sm:$0xff]  ;;  %636 = vmatprep.subr.bf16.mxu0 %v635_v14  ;;  %666 = vmatprep.subr.bf16.mxu1 %v989_v0  ;;  %v639_v23 = vpack.c.bf16 %v248_v21, %v245_v20  ;;  %v249_v26 = vld [vmem:[#allocation5 + $0x88] sm:$0xff]  ;;  %v251_v27 = vld [vmem:[#allocation5 + $0x98] sm:$0xff]  ;;  %v283_v13 = vshrl.u32 %v282_v12, 7  ;;  %s576_s29 = sshll.u32 %s454_s25, 7  ;;  %p881_p3 = scmp.ne.s32.totalorder %s1243_s6, %s880_s10 }
  0x88   : > { %v254_v28 = vld [vmem:[#allocation5 + $0xb0] sm:$0xff]  ;;  %v641_v29 = vpack.c.bf16 %v247_v24, %v244_v22  ;;  %v670_v30 = vpack.c.bf16 %v249_v26, %v246_v25  ;;  %v253_v33 = vld [vmem:[#allocation5 + $0xa8] sm:$0xff]  ;;  %v252_v34 = vld [vmem:[#allocation5 + $0xa0] sm:$0xff]  ;;  %s1241_s20 = scalar_lea.hbm %s1298_s3, %s576_s29  ;;  %s886_s27 = scalar_lea.vmem %s885_s11, 768 }
  0x89   : > { %v250_v31 = vld [vmem:[#allocation5 + $0x90] sm:$0xff]  ;;  %v643_v32 = vpack.c.bf16 %v254_v28, %v251_v27  ;;  %v255_v35 = vld [vmem:[#allocation5 + $0xb8] sm:$0xff]  ;;  %v257_v36 = vld [vmem:[#allocation5 + $0xc8] sm:$0xff]  ;;  %v284_v14 = vsub.s32 0, %v283_v13  ;;  %v292_v15 = vsub.s32 2, %v283_v13  ;;  %v288_v17 = vsub.s32 1, %v283_v13  ;;  %p882_p5 = pnand %p881_p3, %p1150_p9  ;;  %p887_p12 = scmp.lt.s32.totalorder %s1243_s6, %s885_s11 }
  0x8a   : > { %638 = vmatpush1.bf16.msra.mxu0 %v637_v18  ;;  %668 = vmatpush3.bf16.msra.mxu1 %v667_v19  ;;  %v260_v37 = vld [vmem:[#allocation5 + $0xe0] sm:$0xff]  ;;  %v645_v38 = vpack.c.bf16 %v253_v33, %v250_v31  ;;  %v673_v39 = vpack.c.bf16 %v255_v35, %v252_v34  ;;  %v259_v42 = vld [vmem:[#allocation5 + $0xd8] sm:$0xff]  ;;  %v258_v43 = vld [vmem:[#allocation5 + $0xd0] sm:$0xff]  ;;  %p888_p13 = scmp.lt.s32.totalorder %s886_s27, %s880_s10 }
  0x8b   : > { %640 = vmatprep.subr.bf16.mxu0 %v639_v23  ;;  %669 = vmatprep.subr.bf16.mxu1 %v989_v0  ;;  %v256_v40 = vld [vmem:[#allocation5 + $0xc0] sm:$0xff]  ;;  %v647_v41 = vpack.c.bf16 %v260_v37, %v257_v36  ;;  %v261_v44 = vld [vmem:[#allocation5 + $0xe8] sm:$0xff]  ;;  %v263_v45 = vld [vmem:[#allocation5 + $0xf8] sm:$0xff]  ;;  %p883_p7 = pneg %p882_p5 }
  0x8c   : > { %v266_v46 = vld [vmem:[#allocation5 + $0x110] sm:$0xff]  ;;  %v649_v47 = vpack.c.bf16 %v259_v42, %v256_v40  ;;  %v676_v48 = vpack.c.bf16 %v261_v44, %v258_v43  ;;  %v265_v51 = vld [vmem:[#allocation5 + $0x108] sm:$0xff]  ;;  %v264_v52 = vld [vmem:[#allocation5 + $0x100] sm:$0xff]  ;;  %p889_p2 = por %p888_p13, %p887_p12 }
  0x8d   : > { %v262_v49 = vld [vmem:[#allocation5 + $0xf0] sm:$0xff]  ;;  %v651_v50 = vpack.c.bf16 %v266_v46, %v263_v45  ;;  %v267_v53 = vld [vmem:[#allocation5 + $0x118] sm:$0xff]  ;;  %v269_v54 = vld [vmem:[#allocation5 + $0x128] sm:$0xff] }
  0x8e   : > { %642 = vmatpush1.bf16.msra.mxu0 %v641_v29  ;;  %671 = vmatpush3.bf16.msra.mxu1 %v670_v30  ;;  %v272_v55 = vld [vmem:[#allocation5 + $0x140] sm:$0xff]  ;;  %v653_v56 = vpack.c.bf16 %v265_v51, %v262_v49  ;;  %v679_v57 = vpack.c.bf16 %v267_v53, %v264_v52  ;;  %v271_v60 = vld [vmem:[#allocation5 + $0x138] sm:$0xff]  ;;  %v270_v61 = vld [vmem:[#allocation5 + $0x130] sm:$0xff]  ;;  %p890_p6 = pnand %p889_p2, %p883_p7 }
  0x8f   : > { %644 = vmatprep.subr.bf16.mxu0 %v643_v32  ;;  %672 = vmatprep.subr.bf16.mxu1 %v989_v0  ;;  %v268_v58 = vld [vmem:[#allocation5 + $0x120] sm:$0xff]  ;;  %v655_v59 = vpack.c.bf16 %v272_v55, %v269_v54  ;;  %v273_v62 = vld [vmem:[#allocation5 + $0x148] sm:$0xff]  ;;  %v275_v63 = vld [vmem:[#allocation5 + $0x158] sm:$0xff] }
  0x90   : > { %v278_v1 = vld [vmem:[#allocation5 + $0x170] sm:$0xff]  ;;  %v657_v2 = vpack.c.bf16 %v271_v60, %v268_v58  ;;  %v682_v3 = vpack.c.bf16 %v273_v62, %v270_v61  ;;  %v277_v6 = vld [vmem:[#allocation5 + $0x168] sm:$0xff]  ;;  %v276_v7 = vld [vmem:[#allocation5 + $0x160] sm:$0xff] }
  0x91   : > { %v274_v4 = vld [vmem:[#allocation5 + $0x150] sm:$0xff]  ;;  %v659_v5 = vpack.c.bf16 %v278_v1, %v275_v63  ;;  %v279_v8 = vld [vmem:[#allocation5 + $0x178] sm:$0xff]  ;;  %v280_v16 = vld [vmem:[#allocation7] sm:$0x7] }
  0x92   : > { %646 = vmatpush1.bf16.msra.mxu0 %v645_v38  ;;  %674 = vmatpush3.bf16.msra.mxu1 %v673_v39  ;;  %v661_v9 = vpack.c.bf16 %v277_v6, %v274_v4  ;;  %v685_v10 = vpack.c.bf16 %v279_v8, %v276_v7  ;;  %v231_v11 = vld [vmem:[%s1216_s4] sm:$0xff]  ;;  %v285_v18 = vrot.slane %v280_v16, %v284_v14 }
  0x93   : > { %648 = vmatprep.subr.bf16.mxu0 %v647_v41  ;;  %675 = vmatprep.subr.bf16.mxu1 %v989_v0  ;;  %v293_v19 = vrot.slane %v280_v16, %v292_v15  ;;  %v289_v20 = vrot.slane %v280_v16, %v288_v17 }
  0x96   : > { %650 = vmatpush1.bf16.msra.mxu0 %v649_v47  ;;  %677 = vmatpush3.bf16.msra.mxu1 %v676_v48 }
  0x97   : > { %652 = vmatprep.subr.bf16.mxu0 %v651_v50  ;;  %678 = vmatprep.subr.bf16.mxu1 %v989_v0 }
  0x9a   : > { %654 = vmatpush1.bf16.msra.mxu0 %v653_v56  ;;  %680 = vmatpush3.bf16.msra.mxu1 %v679_v57 }
  0x9b   : > { %656 = vmatprep.subr.bf16.mxu0 %v655_v59  ;;  %681 = vmatprep.subr.bf16.mxu1 %v989_v0 }
  0x9e   : > { %658 = vmatpush1.bf16.msra.mxu0 %v657_v2  ;;  %683 = vmatpush3.bf16.msra.mxu1 %v682_v3 }
  0x9f   : > { %660 = vmatprep.subr.bf16.mxu0 %v659_v5  ;;  %684 = vmatprep.subr.bf16.mxu1 %v989_v0 }
  0xa2   : > { %662 = vmatpush1.bf16.msra.mxu0 %v661_v9  ;;  %686 = vmatpush3.bf16.msra.mxu1 %v685_v10 }
  0xa5   : > { %362 = vmatmul.mubr.f32.vlgmr.msra.gmra.mrb[0].mxu0 %v231_v11  ;;  %629 = vmatmul.mubr.f32.vlgmr.msra.gmra.mrb[0].mxu1 %v231_v11 }
 0x178   : > { %v363_v0 = vpop.f32.mrb[0].mxu0  ;;  %v434_v21 = vpop.f32.mrb[0].mxu1 }
 0x179   : > { %v364_v22 = vadd.f32 %v363_v0, %v285_v18  ;;  %v435_v23 = vadd.f32 %v434_v21, %v293_v19  ;;  %v365_v24 = vpop.f32.mrb[1].mxu0  ;;  %v630_v25 = vpop.f32.mrb[1].mxu1 }
 0x17a   : > { %v366_v26 = vadd.f32 %v365_v24, %v289_v20 }
 0x17b   : > { %438 = vst [vmem:[%s230_s5] sm:$0xff] %v364_v22  ;;  %440 = vst [vmem:[%s230_s5 + $0x10] sm:$0xff] %v435_v23 }
 0x17c   : > { %439 = vst [vmem:[%s230_s5 + $0x8] sm:$0xff] %v366_v26 }
 0x17d   : > { %893 = shalt.err (!%p890_p6)
}
 0x17e   : > { %s894_s21 = scalar_lea.hbm %s1241_s20, 384  ;;  %s898_s2 = scalar_lea.hbm %s1298_s3, 1536 }
 0x17f   : > { %p895_p11 = scmp.ne.s32.totalorder %s1241_s20, %s894_s21  ;;  %p899_p8 = scmp.lt.u32.totalorder %s1241_s20, %s1298_s3 }
 0x180   : > { %p900_p4 = scmp.lt.u32.totalorder %s898_s2, %s894_s21  ;;  %p902_p3 = scmp.lt.u32.totalorder %s894_s21, %s1241_s20 }
 0x181   : > { %p896_p10 = pnand %p895_p11, %p1150_p9 }
 0x182   : > { %p901_p0 = por %p900_p4, %p899_p8 }
 0x183   : > { %p897_p1 = pneg %p896_p10 }
 0x184   : > { %p903_p5 = por %p902_p3, %p901_p0 }
 0x186   : > { %p904_p7 = pnand %p903_p5, %p897_p1 }
 0x188   : > { %907 = shalt.err (!%p904_p7)
}
 0x189   : > { %700 = dma.vmem_to_hbm [thread:$0]  (%p1150_p9), %s1243_s6, 384, %s1241_s20, %s442_s9  }
 0x18a PF: > { %s1322_s23 = sld [smem:[#allocation12_spill]]  ;;  %p722_p12 = scmp.ge.s32.totalorder %s982_s19, 2 }
 0x18b   : > { %s470_s24 = sand.u32 1, %s954_s12  }
 0x18c   : > { %s471_s25 = scalar_lea.sflag [#allocation4], %s470_s24 }
 0x190   : > { %p1323_p13 = scmp.ne.s32.totalorder %s1322_s23, 0 }
 0x192   : > { %p714_p2 = pnand %p722_p12, %p1323_p13 }
 0x194   : > { %949 = dma.done.wait (!%p714_p2), %s471_s25, 384  }
 0x195   : > { %951 = vsyncadd (!%p714_p2), %s471_s25, 4294966912  ;;  %s20_s19 = sadd.s32 1, %s982_s19   ;;  %s1324_s30 = sld [smem:[#allocation13_spill]] }
 0x196   : > { %p17_p6 = scmp.ge.s32.totalorder %s20_s19, 6   ;;  %s1325_s12 = smov %s958_s13 }
 0x197   : > { %s1326_s13 = smov %s962_s14  ;;  %s1327_s14 = smov %s1167_s1 }
 0x198   : > { %s1328_s15 = smov %s974_s17  ;;  %s1329_s16 = smov %s978_s18 }
 0x199   : > { %s1331_s18 = smov %s1337_s28  ;;  %19 = sbr.rel (!%p17_p6) target bundleno = 11 (0xb), region = 85 }
 0x19b   : > { %s1330_s17 = smov %s1324_s30 }
 0x1a0   :  { %476 = vsyncpa [#allocation3], 1 }
 0x1a1   :  { %478 = vsyncpa [#allocation3 + $0x1], 1 }
 0x1a2   :  { %479 = vsyncpa [#allocation6], 1 }
 0x1a3   :  { %480 = vsyncpa [#allocation4], 1 }
 0x1a4   :  { %482 = vsyncpa [#allocation4 + $0x1], 1 }

</bundles_post_ra>
